<compile_context>
chip_gen: v7x
topology: tpu7x:2x2x1
jax: 0.10.0
libtpu: 0.0.40
codegen_flags: <defaults>
</compile_context>

<pallas_src>
import functools

import jax
import jax.numpy as jnp
from jax.experimental import pallas as pl
from jax.experimental.pallas import tpu as pltpu

LN_EPS = 1e-5  # PyTorch nn.LayerNorm default eps


# ----------------------------------------------------------------------------
# Kernel
# ----------------------------------------------------------------------------

def _head(xy_bf16, w1_ref, b1_ref, w2_ref, b2_ref, w3_ref, b3_scalar):
    """One critic head: Linear->LN->ReLU->Linear->LN->ReLU->Linear(256->1)."""
    # Layer 1: (TB, 512) f32 accumulation on the MXU.
    h = jnp.dot(xy_bf16, w1_ref[...], preferred_element_type=jnp.float32) + b1_ref[...]

    # LayerNorm(512): one-pass variance in f32; scale deferred through ReLU.
    m1 = jnp.mean(h, axis=-1, keepdims=True)
    e1 = jnp.mean(h * h, axis=-1, keepdims=True)
    s1 = jax.lax.rsqrt(jnp.maximum(e1 - m1 * m1, 0.0) + LN_EPS)   # (TB, 1) > 0
    a1 = jnp.maximum(h - m1, 0.0)                                  # relu(centered), unscaled

    # Layer 2: per-row scale s1 commutes through the dot -> apply to the
    # smaller (TB, 256) result instead of the (TB, 512) activations.
    z = (s1 * jnp.dot(a1.astype(jnp.bfloat16), w2_ref[...],
                      preferred_element_type=jnp.float32)) + b2_ref[...]

    # LayerNorm(256), same trick.
    m2 = jnp.mean(z, axis=-1, keepdims=True)
    e2 = jnp.mean(z * z, axis=-1, keepdims=True)
    s2 = jax.lax.rsqrt(jnp.maximum(e2 - m2 * m2, 0.0) + LN_EPS)    # (TB, 1) > 0
    a2 = jnp.maximum(z - m2, 0.0)

    # Final layer lane-dense on VPU/XLU (avoids an N=1 matmul); fold s2 into q.
    r = jnp.sum(a2 * w3_ref[...].astype(jnp.float32), axis=-1, keepdims=True)
    return s2 * r + b3_scalar                                       # (TB, 1)


def twin_critic_kernel(
    xy_ref,                                             # (TB, in_dim) bf16
    w1a_ref, b1a_ref, w2a_ref, b2a_ref, w3a_ref,        # head 1
    w1b_ref, b1b_ref, w2b_ref, b2b_ref, w3b_ref,        # head 2
    b3_ref,                                             # (2,) f32 in SMEM
    q_ref,                                              # (TB, 2) f32 out
):
    xy = xy_ref[...]
    # Heads computed sequentially so only one (TB,512) f32 slab is live at once.
    q1 = _head(xy, w1a_ref, b1a_ref, w2a_ref, b2a_ref, w3a_ref, b3_ref[0])
    q2 = _head(xy, w1b_ref, b1b_ref, w2b_ref, b2b_ref, w3b_ref, b3_ref[1])
    # Single (TB, 2) store for both heads.
    lane = jax.lax.broadcasted_iota(jnp.int32, q_ref.shape, 1)
    q_ref[...] = jnp.where(lane == 0, q1, q2).astype(q_ref.dtype)


# ----------------------------------------------------------------------------
# Wrapper
# ----------------------------------------------------------------------------

_WEIGHT_ORDER = ("q1.w1", "q1.b1", "q1.w2", "q1.b2", "q1.w3",
                 "q2.w1", "q2.b1", "q2.w2", "q2.b2", "q2.w3")


def detect_num_tensorcores():
    """Best-effort TensorCores-per-chip (2 on v7x); falls back to 1."""
    try:
        info = pltpu.get_tpu_info()
        for name in ("num_cores", "core_count", "num_tensorcores", "tensorcore_count"):
            n = getattr(info, name, None)
            if n:
                return max(1, int(n))
    except Exception:
        pass
    return 1


def _pick_batch_tile(B, block_b, num_cores):
    """Batch tile: big tiles amortize per-grid-step overhead; on multi-TC chips
    make sure the grid has >= num_cores steps so the parallel axis shards."""
    block_b = max(8, (int(block_b) // 8) * 8)
    TB = B if B <= block_b else block_b
    if num_cores > 1 and B >= 16:
        per_core = -(-B // num_cores)                 # cdiv
        per_core = max(16, -(-per_core // 16) * 16)   # round up (bf16-safe sublanes)
        TB = min(TB, per_core)
    return TB


@functools.partial(jax.jit, static_argnames=("block_b", "num_cores"))
def twin_critic_forward(x, y, packed, block_b=512, num_cores=1):
    """x:(B,state_dim) f32, y:(B,action_dim) f32, packed: kernel-layout params."""
    B, state_dim = x.shape
    action_dim = y.shape[1]
    in_dim = state_dim + action_dim

    # torch.cat equivalent, fused with a single bf16 cast in XLA (halves
    # activation HBM traffic and removes in-kernel casts / the K=8 second dot).
    xy = jnp.concatenate([x, y], axis=-1).astype(jnp.bfloat16)

    TB = _pick_batch_tile(B, block_b, num_cores)
    grid = (pl.cdiv(B, TB),)
    # Note: when B % TB != 0 the padded rows of the last tile compute garbage
    # that is discarded on writeback (row-local math, never read back).

    args = [xy] + [packed[k] for k in _WEIGHT_ORDER] + [packed["b3"]]

    in_specs = [
        pl.BlockSpec((TB, in_dim), lambda i: (i, 0)),
    ] + [
        # Weights: full-array blocks, constant index map -> VMEM-resident
        # across batch tiles (no re-DMA per grid step).
        pl.BlockSpec(packed[k].shape, lambda i: (0, 0))
        for k in _WEIGHT_ORDER
    ] + [
        pl.BlockSpec(memory_space=pltpu.MemorySpace.SMEM),   # b3 scalars
    ]
    out_specs = pl.BlockSpec((TB, 2), lambda i: (i, 0))
    out_shape = jax.ShapeDtypeStruct((B, 2), jnp.float32)

    cp = dict(dimension_semantics=("parallel",))
    if TB > 1024:
        # Live f32 intermediates grow with TB; raise the scoped-VMEM limit
        # (v5e's 16 MiB default binds first, then v7x's 32 MiB).
        cp["vmem_limit_bytes"] = 64 * 1024 * 1024

    q = pl.pallas_call(
        twin_critic_kernel,
        grid=grid,
        out_shape=out_shape,
        in_specs=in_specs,
        out_specs=out_specs,
        compiler_params=pltpu.CompilerParams(**cp),
    )(*args)
    return q[:, 0:1], q[:, 1:2]


# ----------------------------------------------------------------------------
# Parameter construction (PyTorch semantics) and packing into kernel layout.
# ----------------------------------------------------------------------------

def _orthogonal_linear(key, in_features, out_features):
    """PyTorch layout: weight (out, in) orthogonal_, bias (out,) zeros."""
    w = jax.nn.initializers.orthogonal()(key, (out_features, in_features), jnp.float32)
    b = jnp.zeros((out_features,), jnp.float32)
    return w, b


def init_twin_critic_params(key, state_dim, action_dim):
    in_dim = state_dim + action_dim
    keys = jax.random.split(key, 6)
    p = {}
    p["q1.w1"], p["q1.b1"] = _orthogonal_linear(keys[0], in_dim, 512)
    p["q1.w2"], p["q1.b2"] = _orthogonal_linear(keys[1], 512, 256)
    p["q1.w3"], p["q1.b3"] = _orthogonal_linear(keys[2], 256, 1)
    p["q2.w1"], p["q2.b1"] = _orthogonal_linear(keys[3], in_dim, 512)
    p["q2.w2"], p["q2.b2"] = _orthogonal_linear(keys[4], 512, 256)
    p["q2.w3"], p["q2.b3"] = _orthogonal_linear(keys[5], 256, 1)
    return p


def pack_params(p, weight_dtype=jnp.bfloat16):
    """Pack PyTorch-layout f32 params into the transposed bf16 kernel layout."""
    packed = {}
    for head in ("q1", "q2"):
        packed[f"{head}.w1"] = p[f"{head}.w1"].T.astype(weight_dtype)        # (in_dim, 512)
        packed[f"{head}.b1"] = p[f"{head}.b1"][None, :].astype(jnp.float32)  # (1, 512)
        packed[f"{head}.w2"] = p[f"{head}.w2"].T.astype(weight_dtype)        # (512, 256)
        packed[f"{head}.b2"] = p[f"{head}.b2"][None, :].astype(jnp.float32)  # (1, 256)
        packed[f"{head}.w3"] = p[f"{head}.w3"].astype(weight_dtype)          # (1, 256) lane-dense
    packed["b3"] = jnp.stack([p["q1.b3"][0], p["q2.b3"][0]]).astype(jnp.float32)  # (2,) SMEM
    return packed


# ----------------------------------------------------------------------------
# Pure-JAX reference in the straightforward (PyTorch-order) formulation with
# the same bf16 weight/activation dtype strategy, for a correctness check.
# ----------------------------------------------------------------------------

def _ln_relu_ref(h):
    m = jnp.mean(h, -1, keepdims=True)
    c = h - m
    v = jnp.mean(c * c, -1, keepdims=True)
    return jnp.maximum(c * jax.lax.rsqrt(v + LN_EPS), 0.0)


def _reference_forward(x, y, packed):
    xy = jnp.concatenate([x, y], axis=-1).astype(jnp.bfloat16)

    def head(prefix, b3):
        h = jnp.dot(xy, packed[f"{prefix}.w1"],
                    preferred_element_type=jnp.float32) + packed[f"{prefix}.b1"]
        h = _ln_relu_ref(h)
        h = jnp.dot(h.astype(jnp.bfloat16), packed[f"{prefix}.w2"],
                    preferred_element_type=jnp.float32) + packed[f"{prefix}.b2"]
        h = _ln_relu_ref(h)
        return jnp.sum(h * packed[f"{prefix}.w3"].astype(jnp.float32),
                       -1, keepdims=True) + b3

    return head("q1", packed["b3"][0]), head("q2", packed["b3"][1])


if __name__ == "__main__":
    state_dim, action_dim, batch = 24, 8, 8

    key = jax.random.PRNGKey(0)
    kx, ky, kp = jax.random.split(key, 3)
    x = jax.random.normal(kx, (batch, state_dim), jnp.float32)
    y = jax.random.normal(ky, (batch, action_dim), jnp.float32)

    params = init_twin_critic_params(kp, state_dim, action_dim)
    packed = pack_params(params)

    num_cores = detect_num_tensorcores()
    q1, q2 = twin_critic_forward(x, y, packed, num_cores=num_cores)
    jax.block_until_ready((q1, q2))

    r1, r2 = _reference_forward(x, y, packed)
    assert q1.shape == (batch, 1) and q2.shape == (batch, 1)
    assert jnp.allclose(q1, r1, atol=2e-2, rtol=2e-2)
    assert jnp.allclose(q2, r2, atol=2e-2, rtol=2e-2)

    print("KERNEL_OK")
</pallas_src>

<mosaic_0001>
module attributes {stable_mosaic.version = 11 : i64} {
  func.func @twin_critic_kernel(%arg0: i32, %arg1: memref<8x32xbf16, #tpu.memory_space<vmem>>, %arg2: memref<32x512xbf16, #tpu.memory_space<vmem>>, %arg3: memref<1x512xf32, #tpu.memory_space<vmem>>, %arg4: memref<512x256xbf16, #tpu.memory_space<vmem>>, %arg5: memref<1x256xf32, #tpu.memory_space<vmem>>, %arg6: memref<1x256xbf16, #tpu.memory_space<vmem>>, %arg7: memref<32x512xbf16, #tpu.memory_space<vmem>>, %arg8: memref<1x512xf32, #tpu.memory_space<vmem>>, %arg9: memref<512x256xbf16, #tpu.memory_space<vmem>>, %arg10: memref<1x256xf32, #tpu.memory_space<vmem>>, %arg11: memref<1x256xbf16, #tpu.memory_space<vmem>>, %arg12: memref<2xf32, #tpu.memory_space<smem>>, %arg13: memref<8x2xf32, #tpu.memory_space<vmem>>) attributes {dimension_semantics = [#tpu.dimension_semantics<parallel>], iteration_bounds = array<i64: 1>, scalar_prefetch = 0 : i64, scratch_operands = 0 : i64, tpu.core_type = #tpu.core_type<tc>, window_params = [{transform_indices = @transform_0, window_bounds = array<i64: 8, 32>}, {pipeline_mode = #tpu.pipeline_mode<synchronous>, transform_indices = @transform_1, window_bounds = array<i64: 32, 512>}, {pipeline_mode = #tpu.pipeline_mode<synchronous>, transform_indices = @transform_2, window_bounds = array<i64: 1, 512>}, {pipeline_mode = #tpu.pipeline_mode<synchronous>, transform_indices = @transform_3, window_bounds = array<i64: 512, 256>}, {pipeline_mode = #tpu.pipeline_mode<synchronous>, transform_indices = @transform_4, window_bounds = array<i64: 1, 256>}, {pipeline_mode = #tpu.pipeline_mode<synchronous>, transform_indices = @transform_5, window_bounds = array<i64: 1, 256>}, {pipeline_mode = #tpu.pipeline_mode<synchronous>, transform_indices = @transform_6, window_bounds = array<i64: 32, 512>}, {pipeline_mode = #tpu.pipeline_mode<synchronous>, transform_indices = @transform_7, window_bounds = array<i64: 1, 512>}, {pipeline_mode = #tpu.pipeline_mode<synchronous>, transform_indices = @transform_8, window_bounds = array<i64: 512, 256>}, {pipeline_mode = #tpu.pipeline_mode<synchronous>, transform_indices = @transform_9, window_bounds = array<i64: 1, 256>}, {pipeline_mode = #tpu.pipeline_mode<synchronous>, transform_indices = @transform_10, window_bounds = array<i64: 1, 256>}, {transform_indices = @transform_11, window_bounds = array<i64: 2>}, {transform_indices = @transform_12, window_bounds = array<i64: 8, 2>}]} {
    %c0 = arith.constant 0 : index
    %c0_0 = arith.constant 0 : index
    %0 = vector.load %arg1[%c0, %c0_0] : memref<8x32xbf16, #tpu.memory_space<vmem>>, vector<8x32xbf16>
    %c0_1 = arith.constant 0 : index
    %1 = memref.load %arg12[%c0_1] : memref<2xf32, #tpu.memory_space<smem>>
    %c0_2 = arith.constant 0 : index
    %c0_3 = arith.constant 0 : index
    %2 = vector.load %arg2[%c0_2, %c0_3] : memref<32x512xbf16, #tpu.memory_space<vmem>>, vector<32x512xbf16>
    %cst = arith.constant dense<0.000000e+00> : vector<8x512xf32>
    %3 = tpu.matmul %0, %2, %cst {dimension_numbers = #tpu.dot_dimension_numbers<[1], [0], [0], [1], [0, 0, 1, 1], [], []>} : vector<8x32xbf16>, vector<32x512xbf16>, vector<8x512xf32> -> vector<8x512xf32>
    %c0_4 = arith.constant 0 : index
    %c0_5 = arith.constant 0 : index
    %4 = vector.load %arg3[%c0_4, %c0_5] : memref<1x512xf32, #tpu.memory_space<vmem>>, vector<1x512xf32>
    %5 = vector.broadcast %4 : vector<1x512xf32> to vector<8x512xf32>
    %6 = arith.addf %3, %5 : vector<8x512xf32>
    %cst_6 = arith.constant dense<0.000000e+00> : vector<8xf32>
    %7 = vector.multi_reduction <add>, %6, %cst_6 [1] : vector<8x512xf32> to vector<8xf32>
    %8 = vector.shape_cast %7 : vector<8xf32> to vector<8x1xf32>
    %cst_7 = arith.constant 5.120000e+02 : f32
    %9 = vector.broadcast %cst_7 : f32 to vector<8x1xf32>
    %10 = arith.divf %8, %9 : vector<8x1xf32>
    %11 = arith.mulf %6, %6 : vector<8x512xf32>
    %cst_8 = arith.constant dense<0.000000e+00> : vector<8xf32>
    %12 = vector.multi_reduction <add>, %11, %cst_8 [1] : vector<8x512xf32> to vector<8xf32>
    %13 = vector.shape_cast %12 : vector<8xf32> to vector<8x1xf32>
    %cst_9 = arith.constant 5.120000e+02 : f32
    %14 = vector.broadcast %cst_9 : f32 to vector<8x1xf32>
    %15 = arith.divf %13, %14 : vector<8x1xf32>
    %16 = arith.mulf %10, %10 : vector<8x1xf32>
    %17 = arith.subf %15, %16 : vector<8x1xf32>
    %cst_10 = arith.constant 0.000000e+00 : f32
    %18 = vector.broadcast %cst_10 : f32 to vector<8x1xf32>
    %19 = arith.maximumf %17, %18 : vector<8x1xf32>
    %cst_11 = arith.constant 9.99999974E-6 : f32
    %20 = vector.broadcast %cst_11 : f32 to vector<8x1xf32>
    %21 = arith.addf %19, %20 : vector<8x1xf32>
    %22 = math.rsqrt %21 : vector<8x1xf32>
    %23 = vector.broadcast %10 : vector<8x1xf32> to vector<8x512xf32>
    %24 = arith.subf %6, %23 : vector<8x512xf32>
    %cst_12 = arith.constant 0.000000e+00 : f32
    %25 = vector.broadcast %cst_12 : f32 to vector<8x512xf32>
    %26 = arith.maximumf %24, %25 : vector<8x512xf32>
    %27 = arith.truncf %26 : vector<8x512xf32> to vector<8x512xbf16>
    %c0_13 = arith.constant 0 : index
    %c0_14 = arith.constant 0 : index
    %28 = vector.load %arg4[%c0_13, %c0_14] : memref<512x256xbf16, #tpu.memory_space<vmem>>, vector<512x256xbf16>
    %cst_15 = arith.constant dense<0.000000e+00> : vector<8x256xf32>
    %29 = tpu.matmul %27, %28, %cst_15 {dimension_numbers = #tpu.dot_dimension_numbers<[1], [0], [0], [1], [0, 0, 1, 1], [], []>} : vector<8x512xbf16>, vector<512x256xbf16>, vector<8x256xf32> -> vector<8x256xf32>
    %30 = vector.broadcast %22 : vector<8x1xf32> to vector<8x256xf32>
    %31 = arith.mulf %30, %29 : vector<8x256xf32>
    %c0_16 = arith.constant 0 : index
    %c0_17 = arith.constant 0 : index
    %32 = vector.load %arg5[%c0_16, %c0_17] : memref<1x256xf32, #tpu.memory_space<vmem>>, vector<1x256xf32>
    %33 = vector.broadcast %32 : vector<1x256xf32> to vector<8x256xf32>
    %34 = arith.addf %31, %33 : vector<8x256xf32>
    %cst_18 = arith.constant dense<0.000000e+00> : vector<8xf32>
    %35 = vector.multi_reduction <add>, %34, %cst_18 [1] : vector<8x256xf32> to vector<8xf32>
    %36 = vector.shape_cast %35 : vector<8xf32> to vector<8x1xf32>
    %cst_19 = arith.constant 2.560000e+02 : f32
    %37 = vector.broadcast %cst_19 : f32 to vector<8x1xf32>
    %38 = arith.divf %36, %37 : vector<8x1xf32>
    %39 = arith.mulf %34, %34 : vector<8x256xf32>
    %cst_20 = arith.constant dense<0.000000e+00> : vector<8xf32>
    %40 = vector.multi_reduction <add>, %39, %cst_20 [1] : vector<8x256xf32> to vector<8xf32>
    %41 = vector.shape_cast %40 : vector<8xf32> to vector<8x1xf32>
    %cst_21 = arith.constant 2.560000e+02 : f32
    %42 = vector.broadcast %cst_21 : f32 to vector<8x1xf32>
    %43 = arith.divf %41, %42 : vector<8x1xf32>
    %44 = arith.mulf %38, %38 : vector<8x1xf32>
    %45 = arith.subf %43, %44 : vector<8x1xf32>
    %cst_22 = arith.constant 0.000000e+00 : f32
    %46 = vector.broadcast %cst_22 : f32 to vector<8x1xf32>
    %47 = arith.maximumf %45, %46 : vector<8x1xf32>
    %cst_23 = arith.constant 9.99999974E-6 : f32
    %48 = vector.broadcast %cst_23 : f32 to vector<8x1xf32>
    %49 = arith.addf %47, %48 : vector<8x1xf32>
    %50 = math.rsqrt %49 : vector<8x1xf32>
    %51 = vector.broadcast %38 : vector<8x1xf32> to vector<8x256xf32>
    %52 = arith.subf %34, %51 : vector<8x256xf32>
    %cst_24 = arith.constant 0.000000e+00 : f32
    %53 = vector.broadcast %cst_24 : f32 to vector<8x256xf32>
    %54 = arith.maximumf %52, %53 : vector<8x256xf32>
    %c0_25 = arith.constant 0 : index
    %c0_26 = arith.constant 0 : index
    %55 = vector.load %arg6[%c0_25, %c0_26] : memref<1x256xbf16, #tpu.memory_space<vmem>>, vector<1x256xbf16>
    %56 = arith.extf %55 : vector<1x256xbf16> to vector<1x256xf32>
    %57 = vector.broadcast %56 : vector<1x256xf32> to vector<8x256xf32>
    %58 = arith.mulf %54, %57 : vector<8x256xf32>
    %cst_27 = arith.constant dense<0.000000e+00> : vector<8xf32>
    %59 = vector.multi_reduction <add>, %58, %cst_27 [1] : vector<8x256xf32> to vector<8xf32>
    %60 = vector.shape_cast %59 : vector<8xf32> to vector<8x1xf32>
    %61 = arith.mulf %50, %60 : vector<8x1xf32>
    %62 = vector.broadcast %1 : f32 to vector<8x1xf32>
    %63 = arith.addf %61, %62 : vector<8x1xf32>
    %c1 = arith.constant 1 : index
    %64 = memref.load %arg12[%c1] : memref<2xf32, #tpu.memory_space<smem>>
    %c0_28 = arith.constant 0 : index
    %c0_29 = arith.constant 0 : index
    %65 = vector.load %arg7[%c0_28, %c0_29] : memref<32x512xbf16, #tpu.memory_space<vmem>>, vector<32x512xbf16>
    %cst_30 = arith.constant dense<0.000000e+00> : vector<8x512xf32>
    %66 = tpu.matmul %0, %65, %cst_30 {dimension_numbers = #tpu.dot_dimension_numbers<[1], [0], [0], [1], [0, 0, 1, 1], [], []>} : vector<8x32xbf16>, vector<32x512xbf16>, vector<8x512xf32> -> vector<8x512xf32>
    %c0_31 = arith.constant 0 : index
    %c0_32 = arith.constant 0 : index
    %67 = vector.load %arg8[%c0_31, %c0_32] : memref<1x512xf32, #tpu.memory_space<vmem>>, vector<1x512xf32>
    %68 = vector.broadcast %67 : vector<1x512xf32> to vector<8x512xf32>
    %69 = arith.addf %66, %68 : vector<8x512xf32>
    %cst_33 = arith.constant dense<0.000000e+00> : vector<8xf32>
    %70 = vector.multi_reduction <add>, %69, %cst_33 [1] : vector<8x512xf32> to vector<8xf32>
    %71 = vector.shape_cast %70 : vector<8xf32> to vector<8x1xf32>
    %cst_34 = arith.constant 5.120000e+02 : f32
    %72 = vector.broadcast %cst_34 : f32 to vector<8x1xf32>
    %73 = arith.divf %71, %72 : vector<8x1xf32>
    %74 = arith.mulf %69, %69 : vector<8x512xf32>
    %cst_35 = arith.constant dense<0.000000e+00> : vector<8xf32>
    %75 = vector.multi_reduction <add>, %74, %cst_35 [1] : vector<8x512xf32> to vector<8xf32>
    %76 = vector.shape_cast %75 : vector<8xf32> to vector<8x1xf32>
    %cst_36 = arith.constant 5.120000e+02 : f32
    %77 = vector.broadcast %cst_36 : f32 to vector<8x1xf32>
    %78 = arith.divf %76, %77 : vector<8x1xf32>
    %79 = arith.mulf %73, %73 : vector<8x1xf32>
    %80 = arith.subf %78, %79 : vector<8x1xf32>
    %cst_37 = arith.constant 0.000000e+00 : f32
    %81 = vector.broadcast %cst_37 : f32 to vector<8x1xf32>
    %82 = arith.maximumf %80, %81 : vector<8x1xf32>
    %cst_38 = arith.constant 9.99999974E-6 : f32
    %83 = vector.broadcast %cst_38 : f32 to vector<8x1xf32>
    %84 = arith.addf %82, %83 : vector<8x1xf32>
    %85 = math.rsqrt %84 : vector<8x1xf32>
    %86 = vector.broadcast %73 : vector<8x1xf32> to vector<8x512xf32>
    %87 = arith.subf %69, %86 : vector<8x512xf32>
    %cst_39 = arith.constant 0.000000e+00 : f32
    %88 = vector.broadcast %cst_39 : f32 to vector<8x512xf32>
    %89 = arith.maximumf %87, %88 : vector<8x512xf32>
    %90 = arith.truncf %89 : vector<8x512xf32> to vector<8x512xbf16>
    %c0_40 = arith.constant 0 : index
    %c0_41 = arith.constant 0 : index
    %91 = vector.load %arg9[%c0_40, %c0_41] : memref<512x256xbf16, #tpu.memory_space<vmem>>, vector<512x256xbf16>
    %cst_42 = arith.constant dense<0.000000e+00> : vector<8x256xf32>
    %92 = tpu.matmul %90, %91, %cst_42 {dimension_numbers = #tpu.dot_dimension_numbers<[1], [0], [0], [1], [0, 0, 1, 1], [], []>} : vector<8x512xbf16>, vector<512x256xbf16>, vector<8x256xf32> -> vector<8x256xf32>
    %93 = vector.broadcast %85 : vector<8x1xf32> to vector<8x256xf32>
    %94 = arith.mulf %93, %92 : vector<8x256xf32>
    %c0_43 = arith.constant 0 : index
    %c0_44 = arith.constant 0 : index
    %95 = vector.load %arg10[%c0_43, %c0_44] : memref<1x256xf32, #tpu.memory_space<vmem>>, vector<1x256xf32>
    %96 = vector.broadcast %95 : vector<1x256xf32> to vector<8x256xf32>
    %97 = arith.addf %94, %96 : vector<8x256xf32>
    %cst_45 = arith.constant dense<0.000000e+00> : vector<8xf32>
    %98 = vector.multi_reduction <add>, %97, %cst_45 [1] : vector<8x256xf32> to vector<8xf32>
    %99 = vector.shape_cast %98 : vector<8xf32> to vector<8x1xf32>
    %cst_46 = arith.constant 2.560000e+02 : f32
    %100 = vector.broadcast %cst_46 : f32 to vector<8x1xf32>
    %101 = arith.divf %99, %100 : vector<8x1xf32>
    %102 = arith.mulf %97, %97 : vector<8x256xf32>
    %cst_47 = arith.constant dense<0.000000e+00> : vector<8xf32>
    %103 = vector.multi_reduction <add>, %102, %cst_47 [1] : vector<8x256xf32> to vector<8xf32>
    %104 = vector.shape_cast %103 : vector<8xf32> to vector<8x1xf32>
    %cst_48 = arith.constant 2.560000e+02 : f32
    %105 = vector.broadcast %cst_48 : f32 to vector<8x1xf32>
    %106 = arith.divf %104, %105 : vector<8x1xf32>
    %107 = arith.mulf %101, %101 : vector<8x1xf32>
    %108 = arith.subf %106, %107 : vector<8x1xf32>
    %cst_49 = arith.constant 0.000000e+00 : f32
    %109 = vector.broadcast %cst_49 : f32 to vector<8x1xf32>
    %110 = arith.maximumf %108, %109 : vector<8x1xf32>
    %cst_50 = arith.constant 9.99999974E-6 : f32
    %111 = vector.broadcast %cst_50 : f32 to vector<8x1xf32>
    %112 = arith.addf %110, %111 : vector<8x1xf32>
    %113 = math.rsqrt %112 : vector<8x1xf32>
    %114 = vector.broadcast %101 : vector<8x1xf32> to vector<8x256xf32>
    %115 = arith.subf %97, %114 : vector<8x256xf32>
    %cst_51 = arith.constant 0.000000e+00 : f32
    %116 = vector.broadcast %cst_51 : f32 to vector<8x256xf32>
    %117 = arith.maximumf %115, %116 : vector<8x256xf32>
    %c0_52 = arith.constant 0 : index
    %c0_53 = arith.constant 0 : index
    %118 = vector.load %arg11[%c0_52, %c0_53] : memref<1x256xbf16, #tpu.memory_space<vmem>>, vector<1x256xbf16>
    %119 = arith.extf %118 : vector<1x256xbf16> to vector<1x256xf32>
    %120 = vector.broadcast %119 : vector<1x256xf32> to vector<8x256xf32>
    %121 = arith.mulf %117, %120 : vector<8x256xf32>
    %cst_54 = arith.constant dense<0.000000e+00> : vector<8xf32>
    %122 = vector.multi_reduction <add>, %121, %cst_54 [1] : vector<8x256xf32> to vector<8xf32>
    %123 = vector.shape_cast %122 : vector<8xf32> to vector<8x1xf32>
    %124 = arith.mulf %113, %123 : vector<8x1xf32>
    %125 = vector.broadcast %64 : f32 to vector<8x1xf32>
    %126 = arith.addf %124, %125 : vector<8x1xf32>
    %127 = tpu.iota {dimensions = array<i32: 1>} : vector<8x2xi32>
    %c0_i32 = arith.constant 0 : i32
    %128 = vector.broadcast %c0_i32 : i32 to vector<8x2xi32>
    %129 = arith.cmpi eq, %127, %128 : vector<8x2xi32>
    %130 = vector.shape_cast %63 : vector<8x1xf32> to vector<8x1xf32>
    %131 = vector.broadcast %130 : vector<8x1xf32> to vector<8x2xf32>
    %132 = vector.shape_cast %126 : vector<8x1xf32> to vector<8x1xf32>
    %133 = vector.broadcast %132 : vector<8x1xf32> to vector<8x2xf32>
    %134 = arith.select %129, %131, %133 : vector<8x2xi1>, vector<8x2xf32>
    %c0_55 = arith.constant 0 : index
    %c0_56 = arith.constant 0 : index
    %135 = vector.load %arg13[%c0_55, %c0_56] : memref<8x2xf32, #tpu.memory_space<vmem>>, vector<8x2xf32>
    tpu.vector_store %arg13[%c0_55, %c0_56], %134 {strides = array<i32>} : memref<8x2xf32, #tpu.memory_space<vmem>>, vector<8x2xf32>,
    return
  }
  func.func @transform_0(%arg0: i32) -> (i32, i32) {
    %c0_i32 = arith.constant 0 : i32
    %c0_i32_0 = arith.constant 0 : i32
    return %arg0, %c0_i32 : i32, i32
  }
  func.func @transform_1(%arg0: i32) -> (i32, i32) {
    %c0_i32 = arith.constant 0 : i32
    %c0_i32_0 = arith.constant 0 : i32
    %c0_i32_1 = arith.constant 0 : i32
    return %c0_i32, %c0_i32_0 : i32, i32
  }
  func.func @transform_2(%arg0: i32) -> (i32, i32) {
    %c0_i32 = arith.constant 0 : i32
    %c0_i32_0 = arith.constant 0 : i32
    %c0_i32_1 = arith.constant 0 : i32
    return %c0_i32, %c0_i32_0 : i32, i32
  }
  func.func @transform_3(%arg0: i32) -> (i32, i32) {
    %c0_i32 = arith.constant 0 : i32
    %c0_i32_0 = arith.constant 0 : i32
    %c0_i32_1 = arith.constant 0 : i32
    return %c0_i32, %c0_i32_0 : i32, i32
  }
  func.func @transform_4(%arg0: i32) -> (i32, i32) {
    %c0_i32 = arith.constant 0 : i32
    %c0_i32_0 = arith.constant 0 : i32
    %c0_i32_1 = arith.constant 0 : i32
    return %c0_i32, %c0_i32_0 : i32, i32
  }
  func.func @transform_5(%arg0: i32) -> (i32, i32) {
    %c0_i32 = arith.constant 0 : i32
    %c0_i32_0 = arith.constant 0 : i32
    %c0_i32_1 = arith.constant 0 : i32
    return %c0_i32, %c0_i32_0 : i32, i32
  }
  func.func @transform_6(%arg0: i32) -> (i32, i32) {
    %c0_i32 = arith.constant 0 : i32
    %c0_i32_0 = arith.constant 0 : i32
    %c0_i32_1 = arith.constant 0 : i32
    return %c0_i32, %c0_i32_0 : i32, i32
  }
  func.func @transform_7(%arg0: i32) -> (i32, i32) {
    %c0_i32 = arith.constant 0 : i32
    %c0_i32_0 = arith.constant 0 : i32
    %c0_i32_1 = arith.constant 0 : i32
    return %c0_i32, %c0_i32_0 : i32, i32
  }
  func.func @transform_8(%arg0: i32) -> (i32, i32) {
    %c0_i32 = arith.constant 0 : i32
    %c0_i32_0 = arith.constant 0 : i32
    %c0_i32_1 = arith.constant 0 : i32
    return %c0_i32, %c0_i32_0 : i32, i32
  }
  func.func @transform_9(%arg0: i32) -> (i32, i32) {
    %c0_i32 = arith.constant 0 : i32
    %c0_i32_0 = arith.constant 0 : i32
    %c0_i32_1 = arith.constant 0 : i32
    return %c0_i32, %c0_i32_0 : i32, i32
  }
  func.func @transform_10(%arg0: i32) -> (i32, i32) {
    %c0_i32 = arith.constant 0 : i32
    %c0_i32_0 = arith.constant 0 : i32
    %c0_i32_1 = arith.constant 0 : i32
    return %c0_i32, %c0_i32_0 : i32, i32
  }
  func.func @transform_11(%arg0: i32) -> i32 {
    %c0_i32 = arith.constant 0 : i32
    %c0_i32_0 = arith.constant 0 : i32
    return %c0_i32 : i32
  }
  func.func @transform_12(%arg0: i32) -> (i32, i32) {
    %c0_i32 = arith.constant 0 : i32
    %c0_i32_0 = arith.constant 0 : i32
    return %arg0, %c0_i32 : i32, i32
  }
}

</mosaic_0001>

<bundles_post_ra>
// kernel: twin_critic_forward.1
= control target key start
LH: loop header
LB: loop body
LE: loop exit
PB: predicated region body
PF: predicated region fallthrough
CT: control target
= control target key end

     0   :  { %17 = vsyncpa [#allocation3], 0  ;;  %s2417_s0 = inlined_call_operand.vmem [shape: bf16[8,32], index: 0, kind: input, shape index: {}]   ;;  %s2418_s1 = inlined_call_operand.hbm [shape: bf16[32,512], index: 1, kind: input, shape index: {}]   ;;  %s2419_s2 = inlined_call_operand.vmem [shape: f32[1,512], index: 2, kind: input, shape index: {}]   ;;  %s2420_s3 = inlined_call_operand.hbm [shape: bf16[512,256], index: 3, kind: input, shape index: {}]   ;;  %s2421_s4 = inlined_call_operand.hbm [shape: f32[1,256], index: 4, kind: input, shape index: {}]   ;;  %s2422_s5 = inlined_call_operand.hbm [shape: bf16[1,256], index: 5, kind: input, shape index: {}]   ;;  %s2423_s6 = inlined_call_operand.vmem [shape: bf16[32,512], index: 6, kind: input, shape index: {}]   ;;  %s2424_s7 = inlined_call_operand.vmem [shape: f32[1,512], index: 7, kind: input, shape index: {}]   ;;  %s2425_s8 = inlined_call_operand.hbm [shape: bf16[512,256], index: 8, kind: input, shape index: {}]   ;;  %s2426_s9 = inlined_call_operand.hbm [shape: f32[1,256], index: 9, kind: input, shape index: {}]   ;;  %s2427_s10 = inlined_call_operand.vmem [shape: bf16[1,256], index: 10, kind: input, shape index: {}]   ;;  %s2428_s11 = inlined_call_operand.vmem [shape: f32[2], index: 11, kind: input, shape index: {}]   ;;  %s2429_s12 = inlined_call_operand.vmem [shape: f32[8,2], index: 12, kind: output, shape index: {}]  }
   0x1   :  { %18 = vsyncpa [#allocation6], 0 }
   0x2   :  { %19 = vsyncpa [#allocation9], 0 }
   0x3   :  { %20 = vsyncpa [#allocation12], 0 }
   0x4   :  { %21 = vsyncpa [#allocation4], 0  ;;  %s2132_s21 = smov [#allocation5]   ;;  %s1978_s25 = scalar_lea.hbm %s2420_s3, 8192 }
   0x5   :  { %s43_s22 = sshll.u32 %s2132_s21, 4  ;;  %p1979_p0 = scmp.ne.s32.totalorder %s2420_s3, %s1978_s25  ;;  %s44_s22 = int_to_ptr.vmem [resolvable:$true] %s43_s22 }
   0x6   :  { %p1982_p1 = scmp.lt.u32.totalorder %s1978_s25, %s2420_s3 }
   0x8   :  { %p1984_p2 = pnand %p1982_p1, %p1979_p0 }
   0xa   :  { %1987 = shalt.err (!%p1984_p2)
}
   0xb   :  { %s1988_s30 = scalar_lea.vmem %s44_s22, 8192  ;;  %p1993_p4 = scmp.lt.s32.totalorder %s44_s22, %s44_s22 }
   0xc   :  { %p1989_p3 = scmp.ne.s32.totalorder %s44_s22, %s1988_s30  ;;  %p1994_p5 = scmp.lt.s32.totalorder %s1988_s30, %s1988_s30 }
   0xe   :  { %p1995_p6 = por %p1994_p5, %p1993_p4 }
  0x10   :  { %p1996_p7 = pnand %p1995_p6, %p1989_p3 }
  0x12   :  { %1999 = shalt.err (!%p1996_p7)
}
  0x13   :  { %s2133_s13 = smov 128   ;;  %s2134_s14 = smov 8  }
  0x14   :  { %49 = dma.hbm_to_vmem [thread:$0]  %s2420_s3, 8192, %s44_s22, [#allocation6], %s2133_s13, %s2133_s13, %s2134_s14  }
  0x15   :  { %s2135_s17 = smov [#allocation8]   ;;  %s2136_s19 = smov [#allocation2]  }
  0x16   :  { %s66_s18 = sshll.u32 %s2135_s17, 4  ;;  %s29_s20 = sshll.u32 %s2136_s19, 4  ;;  %s67_s18 = int_to_ptr.vmem [resolvable:$true] %s66_s18  ;;  %s30_s20 = int_to_ptr.vmem [resolvable:$true] %s29_s20 }
  0x17   :  { %s2000_s24 = scalar_lea.hbm %s2422_s5, 32 }
  0x18   :  { %p2001_p8 = scmp.ne.s32.totalorder %s2422_s5, %s2000_s24  ;;  %p2004_p9 = scmp.lt.u32.totalorder %s2000_s24, %s2422_s5 }
  0x1a   :  { %p2006_p10 = pnand %p2004_p9, %p2001_p8 }
  0x1c   :  { %2009 = shalt.err (!%p2006_p10)
}
  0x1d   :  { %s2010_s3 = scalar_lea.vmem %s67_s18, 32  ;;  %p2015_p12 = scmp.lt.s32.totalorder %s67_s18, %s67_s18 }
  0x1e   :  { %p2011_p11 = scmp.ne.s32.totalorder %s67_s18, %s2010_s3  ;;  %p2016_p13 = scmp.lt.s32.totalorder %s2010_s3, %s2010_s3 }
  0x20   :  { %p2017_p0 = por %p2016_p13, %p2015_p12 }
  0x22   :  { %p2018_p1 = pnand %p2017_p0, %p2011_p11 }
  0x24   :  { %2021 = shalt.err (!%p2018_p1)
}
  0x25   :  { %69 = dma.hbm_to_vmem [thread:$0]  %s2422_s5, 32, %s67_s18, [#allocation9]  }
  0x26   :  { %s2022_s16 = scalar_lea.hbm %s2418_s1, 1024 }
  0x27   :  { %p2023_p2 = scmp.ne.s32.totalorder %s2418_s1, %s2022_s16  ;;  %p2026_p3 = scmp.lt.u32.totalorder %s2022_s16, %s2418_s1 }
  0x29   :  { %p2028_p4 = pnand %p2026_p3, %p2023_p2 }
  0x2b   :  { %2031 = shalt.err (!%p2028_p4)
}
  0x2c   :  { %s2032_s24 = scalar_lea.vmem %s30_s20, 1024  ;;  %p2037_p6 = scmp.lt.s32.totalorder %s30_s20, %s30_s20 }
  0x2d   :  { %p2033_p5 = scmp.ne.s32.totalorder %s30_s20, %s2032_s24  ;;  %p2038_p7 = scmp.lt.s32.totalorder %s2032_s24, %s2032_s24 }
  0x2f   :  { %p2039_p8 = por %p2038_p7, %p2037_p6 }
  0x31   :  { %p2040_p9 = pnand %p2039_p8, %p2033_p5 }
  0x33   :  { %2043 = shalt.err (!%p2040_p9)
}
  0x34   :  { %s2137_s5 = smov 256   ;;  %s2138_s18 = smov 16  }
  0x35   :  { %35 = dma.hbm_to_vmem [thread:$0]  %s2418_s1, 1024, %s30_s20, [#allocation3], %s2137_s5, %s2137_s5, %s2138_s18  }
  0x36   :  { %s2139_s27 = smov [#allocation7]   ;;  %s2140_s3 = smov [#allocation10]  }
  0x37   :  { %s56_s28 = sshll.u32 %s2139_s27, 4  ;;  %s79_s22 = sshll.u32 %s2140_s3, 4  ;;  %s57_s28 = int_to_ptr.vmem [resolvable:$true] %s56_s28  ;;  %s80_s22 = int_to_ptr.vmem [resolvable:$true] %s79_s22 }
  0x38   :  { %s2044_s15 = scalar_lea.hbm %s2421_s4, 32 }
  0x39   :  { %p2045_p10 = scmp.ne.s32.totalorder %s2421_s4, %s2044_s15  ;;  %p2048_p11 = scmp.lt.u32.totalorder %s2044_s15, %s2421_s4 }
  0x3b   :  { %p2050_p12 = pnand %p2048_p11, %p2045_p10 }
  0x3d   :  { %2053 = shalt.err (!%p2050_p12)
}
  0x3e   :  { %s2054_s1 = scalar_lea.vmem %s57_s28, 32  ;;  %p2059_p0 = scmp.lt.s32.totalorder %s57_s28, %s57_s28 }
  0x3f   :  { %p2055_p13 = scmp.ne.s32.totalorder %s57_s28, %s2054_s1  ;;  %p2060_p1 = scmp.lt.s32.totalorder %s2054_s1, %s2054_s1 }
  0x41   :  { %p2061_p2 = por %p2060_p1, %p2059_p0 }
  0x43   :  { %p2062_p3 = pnand %p2061_p2, %p2055_p13 }
  0x45   :  { %2065 = shalt.err (!%p2062_p3)
}
  0x46   :  { %59 = dma.hbm_to_vmem [thread:$0]  %s2421_s4, 32, %s57_s28, [#allocation6]  }
  0x47   :  { %s2066_s18 = scalar_lea.hbm %s2425_s8, 8192 }
  0x48   :  { %p2067_p4 = scmp.ne.s32.totalorder %s2425_s8, %s2066_s18  ;;  %p2070_p5 = scmp.lt.u32.totalorder %s2066_s18, %s2425_s8 }
  0x4a   :  { %p2072_p6 = pnand %p2070_p5, %p2067_p4 }
  0x4c   :  { %2075 = shalt.err (!%p2072_p6)
}
  0x4d   :  { %s2076_s29 = scalar_lea.vmem %s80_s22, 8192  ;;  %p2081_p8 = scmp.lt.s32.totalorder %s80_s22, %s80_s22 }
  0x4e   :  { %p2077_p7 = scmp.ne.s32.totalorder %s80_s22, %s2076_s29  ;;  %p2082_p9 = scmp.lt.s32.totalorder %s2076_s29, %s2076_s29 }
  0x50   :  { %p2083_p10 = por %p2082_p9, %p2081_p8 }
  0x52   :  { %p2084_p11 = pnand %p2083_p10, %p2077_p7 }
  0x54   :  { %2087 = shalt.err (!%p2084_p11)
}
  0x55   :  { %85 = dma.hbm_to_vmem [thread:$0]  %s2425_s8, 8192, %s80_s22, [#allocation9], %s2133_s13, %s2133_s13, %s2134_s14  }
  0x56   :  { %s2141_s30 = smov [#allocation11]   ;;  %s104_s19 = sshll.u32 %s2428_s11, 4  ;;  %s105_s19 = int_to_ptr.vmem [resolvable:$true] %s104_s19 }
  0x57   :  { %s92_s15 = sshll.u32 %s2141_s30, 4  ;;  %s2088_s20 = scalar_lea.hbm %s2426_s9, 32  ;;  %s93_s15 = int_to_ptr.vmem [resolvable:$true] %s92_s15 }
  0x58   :  { %p2089_p12 = scmp.ne.s32.totalorder %s2426_s9, %s2088_s20  ;;  %p2092_p13 = scmp.lt.u32.totalorder %s2088_s20, %s2426_s9 }
  0x5a   :  { %p2094_p0 = pnand %p2092_p13, %p2089_p12 }
  0x5c   :  { %2097 = shalt.err (!%p2094_p0)
}
  0x5d   :  { %s2098_s8 = scalar_lea.vmem %s93_s15, 32  ;;  %p2103_p2 = scmp.lt.s32.totalorder %s93_s15, %s93_s15 }
  0x5e   :  { %p2099_p1 = scmp.ne.s32.totalorder %s93_s15, %s2098_s8  ;;  %p2104_p3 = scmp.lt.s32.totalorder %s2098_s8, %s2098_s8 }
  0x60   :  { %p2105_p4 = por %p2104_p3, %p2103_p2 }
  0x62   :  { %p2106_p5 = pnand %p2105_p4, %p2099_p1 }
  0x64   :  { %2109 = shalt.err (!%p2106_p5)
}
  0x65   :  { %95 = dma.hbm_to_vmem [thread:$0]  %s2426_s9, 32, %s93_s15, [#allocation12]  }
  0x66   :  { %s2110_s14 = scalar_lea.vmem %s105_s19, 16  ;;  %p2115_p7 = scmp.lt.s32.totalorder %s105_s19, %s105_s19 }
  0x67   :  { %p2111_p6 = scmp.ne.s32.totalorder %s105_s19, %s2110_s14  ;;  %p2116_p8 = scmp.lt.s32.totalorder %s2110_s14, %s2110_s14 }
  0x69   :  { %p2117_p9 = por %p2116_p8, %p2115_p7 }
  0x6b   :  { %p2118_p10 = pnand %p2117_p9, %p2111_p6 }
  0x6d   :  { %2121 = shalt.err (!%p2118_p10)
}
  0x6e   :  { %s2142_s22 = smov [#allocation13]  }
  0x6f   :  { %107 = dma.vmem_to_smem %s105_s19, 16, %s2142_s22, [#allocation4]  }
  0x70   :  { %2122 = dma.done.wait [#allocation3], 1024  }
  0x71   :  { %2123 = vsyncadd [#allocation3], 4294966272 }
  0x72   :  { %2124 = dma.done.wait [#allocation6], 8224  }
  0x73   :  { %2125 = vsyncadd [#allocation6], 4294959072 }
  0x74   :  { %2126 = dma.done.wait [#allocation9], 8224  }
  0x75   :  { %2127 = vsyncadd [#allocation9], 4294959072 }
  0x76   :  { %2128 = dma.done.wait [#allocation12], 32  }
  0x77   :  { %2129 = vsyncadd [#allocation12], 4294967264 }
  0x78   :  { %2130 = dma.done.wait [#allocation4], 16  }
  0x79   :  { %2131 = vsyncadd [#allocation4], 4294967280 }
  0x7a   :  { %129 = sfence }
  0x7b   :  { %v1754_v0 = vld [vmem:[#allocation2 + $0x4] ss:$16 sps:$4 sm:$0xff]   ;;  %v2143_v2 = vmov 0   ;;  %v1758_v3 = vld [vmem:[#allocation2] ss:$16 sps:$4 sm:$0xff]   ;;  %vm203_vm0 = vcmask 261120  }
  0x7c   :  { %v1756_v1 = vld [vmem:[%s2423_s6 + $0x4] ss:$16 sps:$4 sm:$0xff]   ;;  %239 = vmatprep.mubr.bf16.mxu0 %v2143_v2  ;;  %957 = vmatprep.mubr.bf16.mxu1 %v2143_v2  ;;  %v1759_v4 = vld [vmem:[%s2423_s6] ss:$16 sps:$4 sm:$0xff]   ;;  %v1766_v10 = vld [vmem:[#allocation2 + $0x8] ss:$16 sps:$4 sm:$0xff]  }
  0x7d   :  { %207 = vmatprep.subr.bf16.mxu0 %v1754_v0  ;;  %925 = vmatprep.subr.bf16.mxu1 %v1756_v1  ;;  %v1760_v5 = vld [vmem:[#allocation2 + $0x24] ss:$16 sps:$4 sm:$0xff]   ;;  %v1764_v7 = vld [vmem:[#allocation2 + $0x20] ss:$16 sps:$4 sm:$0xff]   ;;  %v1768_v11 = vld [vmem:[#allocation2 + $0xc] ss:$16 sps:$4 sm:$0xff]  }
  0x7e   :  { %208 = vmatpush1.bf16.msra.mxu0 %v1758_v3  ;;  %926 = vmatpush1.bf16.msra.mxu1 %v1759_v4  ;;  %v1762_v6 = vld [vmem:[%s2423_s6 + $0x24] ss:$16 sps:$4 sm:$0xff]   ;;  %v1765_v8 = vld [vmem:[%s2423_s6 + $0x20] ss:$16 sps:$4 sm:$0xff]   ;;  %v1769_v12 = vld [vmem:[%s2423_s6 + $0x8] ss:$16 sps:$4 sm:$0xff]  }
  0x7f   :  { %209 = vmatprep.subr.bf16.mxu0 %v1760_v5  ;;  %927 = vmatprep.subr.bf16.mxu1 %v1762_v6  ;;  %v131_v9 = vld [vmem:[%s2417_s0] sm:$0xf]  ;;  %v1771_v13 = vld [vmem:[%s2423_s6 + $0xc] ss:$16 sps:$4 sm:$0xff]   ;;  %v1772_v15 = vld [vmem:[#allocation2 + $0x28] ss:$16 sps:$4 sm:$0xff]  }
  0x80   :  { %v1774_v14 = vld [vmem:[#allocation2 + $0x2c] ss:$16 sps:$4 sm:$0xff]   ;;  %v1775_v17 = vld [vmem:[%s2423_s6 + $0x28] ss:$16 sps:$4 sm:$0xff]   ;;  %s1659_s8 = sld [smem:[#allocation13 + $0x1]]  ;;  %vm1574_vm2 = vcmask 15360  }
  0x81   :  { %v1777_v16 = vld [vmem:[%s2423_s6 + $0x2c] ss:$16 sps:$4 sm:$0xff]   ;;  %v1778_v18 = vld [vmem:[#allocation5] ss:$8 sps:$4 sm:$0xff]   ;;  %v1781_v23 = vld [vmem:[#allocation5 + $0x10] ss:$8 sps:$4 sm:$0xff]  }
  0x82   :  { %210 = vmatpush1.bf16.msra.mxu0 %v1764_v7  ;;  %928 = vmatpush1.bf16.msra.mxu1 %v1765_v8  ;;  %v1780_v19 = vld [vmem:[#allocation5 + $0x4] ss:$8 sps:$4 sm:$0xff]   ;;  %v1783_v20 = vld [vmem:[#allocation5 + $0x14] ss:$8 sps:$4 sm:$0xff]   ;;  %v1786_v22 = vld [vmem:[#allocation10 + $0x4] ss:$8 sps:$4 sm:$0xff]   ;;  %v143_v8 = vlaneseq }
  0x83   :  { %248 = vmatprep.subr.bf16.mxu0 %v1768_v11  ;;  %966 = vmatprep.subr.bf16.mxu1 %v1771_v13  ;;  %v1784_v21 = vld [vmem:[#allocation10] ss:$8 sps:$4 sm:$0xff]   ;;  %v1792_v24 = vld [vmem:[#allocation10 + $0x14] ss:$8 sps:$4 sm:$0xff]   ;;  %v1790_v26 = vld [vmem:[#allocation10 + $0x10] ss:$8 sps:$4 sm:$0xff]  }
  0x84   :  { %v1789_v25 = vld [vmem:[#allocation5 + $0x24] ss:$8 sps:$4 sm:$0xff]   ;;  %v1798_v27 = vld [vmem:[#allocation10 + $0x24] ss:$8 sps:$4 sm:$0xff]   ;;  %v1795_v29 = vld [vmem:[#allocation5 + $0x34] ss:$8 sps:$4 sm:$0xff]  }
  0x85   :  { %1593 = vmatmul.mubr.msk.bf16.vlgmr.msra.gmra.mrb[0].mxu0 %vm203_vm0, %v131_v9  ;;  %1668 = vmatmul.mubr.msk.bf16.vlgmr.msra.gmra.mrb[0].mxu1 %vm203_vm0, %v131_v9  ;;  %v1787_v28 = vld [vmem:[#allocation5 + $0x20] ss:$8 sps:$4 sm:$0xff]   ;;  %v1796_v30 = vld [vmem:[#allocation10 + $0x20] ss:$8 sps:$4 sm:$0xff]   ;;  %v1793_v32 = vld [vmem:[#allocation5 + $0x30] ss:$8 sps:$4 sm:$0xff]  }
  0x86   :  { %249 = vmatpush1.bf16.msra.mxu0 %v1766_v10  ;;  %967 = vmatpush1.bf16.msra.mxu1 %v1769_v12  ;;  %v1804_v31 = vld [vmem:[#allocation10 + $0x34] ss:$8 sps:$4 sm:$0xff]   ;;  %v1801_v33 = vld [vmem:[#allocation5 + $0x44] ss:$8 sps:$4 sm:$0xff]   ;;  %v1802_v34 = vld [vmem:[#allocation10 + $0x30] ss:$8 sps:$4 sm:$0xff]  }
  0x87   :  { %250 = vmatprep.subr.bf16.mxu0 %v1774_v14  ;;  %968 = vmatprep.subr.bf16.mxu1 %v1777_v16  ;;  %v1810_v35 = vld [vmem:[#allocation10 + $0x44] ss:$8 sps:$4 sm:$0xff]   ;;  %v1807_v37 = vld [vmem:[#allocation5 + $0x54] ss:$8 sps:$4 sm:$0xff]   ;;  %v1808_v38 = vld [vmem:[#allocation10 + $0x40] ss:$8 sps:$4 sm:$0xff]  }
  0x88   :  { %280 = vmatprep.mubr.bf16.mxu0 %v2143_v2  ;;  %998 = vmatprep.mubr.bf16.mxu1 %v2143_v2  ;;  %v1799_v36 = vld [vmem:[#allocation5 + $0x40] ss:$8 sps:$4 sm:$0xff]   ;;  %v1805_v40 = vld [vmem:[#allocation5 + $0x50] ss:$8 sps:$4 sm:$0xff]   ;;  %v1813_v41 = vld [vmem:[#allocation5 + $0x64] ss:$8 sps:$4 sm:$0xff]  }
  0x89   :  { %v1816_v39 = vld [vmem:[#allocation10 + $0x54] ss:$8 sps:$4 sm:$0xff]   ;;  %v1814_v42 = vld [vmem:[#allocation10 + $0x50] ss:$8 sps:$4 sm:$0xff]   ;;  %v1822_v43 = vld [vmem:[#allocation10 + $0x64] ss:$8 sps:$4 sm:$0xff]  }
  0x8a   :  { %251 = vmatpush1.bf16.msra.mxu0 %v1772_v15  ;;  %969 = vmatpush1.bf16.msra.mxu1 %v1775_v17  ;;  %v1811_v44 = vld [vmem:[#allocation5 + $0x60] ss:$8 sps:$4 sm:$0xff]   ;;  %v1819_v45 = vld [vmem:[#allocation5 + $0x74] ss:$8 sps:$4 sm:$0xff]   ;;  %v1820_v46 = vld [vmem:[#allocation10 + $0x60] ss:$8 sps:$4 sm:$0xff]  }
  0x8b   :  { %707 = vmatprep.subr.bf16.mxu0 %v1780_v19  ;;  %1424 = vmatprep.subr.bf16.mxu1 %v1786_v22  ;;  %v1828_v47 = vld [vmem:[#allocation10 + $0x74] ss:$8 sps:$4 sm:$0xff]   ;;  %v1825_v49 = vld [vmem:[#allocation5 + $0x84] ss:$8 sps:$4 sm:$0xff]   ;;  %v1826_v50 = vld [vmem:[#allocation10 + $0x70] ss:$8 sps:$4 sm:$0xff]  }
  0x8c   :  { %v1817_v48 = vld [vmem:[#allocation5 + $0x70] ss:$8 sps:$4 sm:$0xff]   ;;  %v1823_v52 = vld [vmem:[#allocation5 + $0x80] ss:$8 sps:$4 sm:$0xff]   ;;  %v1831_v53 = vld [vmem:[#allocation5 + $0x94] ss:$8 sps:$4 sm:$0xff]  }
  0x8d   :  { %1594 = vmatmul.mubr.msk.bf16.vlgmr.msra.gmra.mrb[4].mxu0 %vm203_vm0, %v131_v9  ;;  %1669 = vmatmul.mubr.msk.bf16.vlgmr.msra.gmra.mrb[4].mxu1 %vm203_vm0, %v131_v9  ;;  %v1834_v51 = vld [vmem:[#allocation10 + $0x84] ss:$8 sps:$4 sm:$0xff]   ;;  %v1832_v54 = vld [vmem:[#allocation10 + $0x80] ss:$8 sps:$4 sm:$0xff]   ;;  %v1840_v55 = vld [vmem:[#allocation10 + $0x94] ss:$8 sps:$4 sm:$0xff]  }
  0x8e   :  { %708 = vmatpush1.bf16.msra.mxu0 %v1778_v18  ;;  %1425 = vmatpush1.bf16.msra.mxu1 %v1784_v21  ;;  %v1829_v56 = vld [vmem:[#allocation5 + $0x90] ss:$8 sps:$4 sm:$0xff]   ;;  %v1837_v57 = vld [vmem:[#allocation5 + $0xa4] ss:$8 sps:$4 sm:$0xff]   ;;  %v1838_v58 = vld [vmem:[#allocation10 + $0x90] ss:$8 sps:$4 sm:$0xff]  }
  0x8f   :  { %709 = vmatprep.subr.bf16.mxu0 %v1783_v20  ;;  %1426 = vmatprep.subr.bf16.mxu1 %v1792_v24  ;;  %v1846_v59 = vld [vmem:[#allocation10 + $0xa4] ss:$8 sps:$4 sm:$0xff]   ;;  %v1843_v61 = vld [vmem:[#allocation5 + $0xb4] ss:$8 sps:$4 sm:$0xff]   ;;  %v1844_v62 = vld [vmem:[#allocation10 + $0xa0] ss:$8 sps:$4 sm:$0xff]  }
  0x90   :  { %v1835_v60 = vld [vmem:[#allocation5 + $0xa0] ss:$8 sps:$4 sm:$0xff]   ;;  %v1841_v0 = vld [vmem:[#allocation5 + $0xb0] ss:$8 sps:$4 sm:$0xff]   ;;  %v1849_v1 = vld [vmem:[#allocation5 + $0xc4] ss:$8 sps:$4 sm:$0xff]  }
  0x91   :  { %v1852_v63 = vld [vmem:[#allocation10 + $0xb4] ss:$8 sps:$4 sm:$0xff]   ;;  %v1850_v2 = vld [vmem:[#allocation10 + $0xb0] ss:$8 sps:$4 sm:$0xff]   ;;  %v1858_v3 = vld [vmem:[#allocation10 + $0xc4] ss:$8 sps:$4 sm:$0xff]  }
  0x92   :  { %710 = vmatpush1.bf16.msra.mxu0 %v1781_v23  ;;  %1427 = vmatpush1.bf16.msra.mxu1 %v1790_v26  ;;  %v1847_v4 = vld [vmem:[#allocation5 + $0xc0] ss:$8 sps:$4 sm:$0xff]   ;;  %v1855_v5 = vld [vmem:[#allocation5 + $0xd4] ss:$8 sps:$4 sm:$0xff]   ;;  %v1856_v6 = vld [vmem:[#allocation10 + $0xc0] ss:$8 sps:$4 sm:$0xff]  }
  0x93   :  { %711 = vmatprep.subr.bf16.mxu0 %v1789_v25  ;;  %1428 = vmatprep.subr.bf16.mxu1 %v1798_v27  ;;  %v1853_v7 = vld [vmem:[#allocation5 + $0xd0] ss:$8 sps:$4 sm:$0xff]   ;;  %v144_v9 = vshrl.u32 %v143_v8, 7  ;;  %v141_v12 = vld [vmem:[%s2419_s2] sm:$0xf] }
  0x94   :  { %v863_v13 = vld [vmem:[%s2424_s7] sm:$0xf] }
  0x95   :  { %v2322_v10 = vsub.s32 0, %v144_v9  ;;  %v2324_v11 = vsub.s32 1, %v144_v9  ;;  %v2336_v22 = vsub.s32 2, %v144_v9  ;;  %v157_v27 = vsub.s32 3, %v144_v9  ;;  %v1867_v9 = vld [vmem:[#allocation5 + $0xf4] ss:$8 sps:$4 sm:$0xff]  }
  0x96   :  { %712 = vmatpush1.bf16.msra.mxu0 %v1787_v28  ;;  %1429 = vmatpush1.bf16.msra.mxu1 %v1796_v30 }
  0x97   :  { %713 = vmatprep.subr.bf16.mxu0 %v1795_v29  ;;  %1430 = vmatprep.subr.bf16.mxu1 %v1804_v31  ;;  %v146_v14 = vrot.slane %v141_v12, %v2322_v10  ;;  %v150_v15 = vrot.slane %v141_v12, %v2324_v11  ;;  %v868_v17 = vrot.slane %v863_v13, %v2322_v10 }
  0x98   :  { %v872_v20 = vrot.slane %v863_v13, %v2324_v11 }
  0x9a   :  { %714 = vmatpush1.bf16.msra.mxu0 %v1793_v32  ;;  %1431 = vmatpush1.bf16.msra.mxu1 %v1802_v34  ;;  %v154_v32 = vrot.slane %v141_v12, %v2336_v22 }
  0x9b   :  { %715 = vmatprep.subr.bf16.mxu0 %v1801_v33  ;;  %1432 = vmatprep.subr.bf16.mxu1 %v1810_v35  ;;  %v876_v33 = vrot.slane %v863_v13, %v2336_v22 }
  0x9e   :  { %716 = vmatpush1.bf16.msra.mxu0 %v1799_v36  ;;  %1433 = vmatpush1.bf16.msra.mxu1 %v1808_v38  ;;  %v158_v36 = vrot.slane %v141_v12, %v157_v27  ;;  %v1870_v12 = vld [vmem:[#allocation10 + $0xe4] ss:$8 sps:$4 sm:$0xff]  }
  0x9f   :  { %717 = vmatprep.subr.bf16.mxu0 %v1807_v37  ;;  %1434 = vmatprep.subr.bf16.mxu1 %v1816_v39  ;;  %v880_v37 = vrot.slane %v863_v13, %v157_v27  ;;  %v1865_v13 = vld [vmem:[#allocation5 + $0xf0] ss:$8 sps:$4 sm:$0xff]  }
  0xa2   :  { %718 = vmatpush1.bf16.msra.mxu0 %v1805_v40  ;;  %1435 = vmatpush1.bf16.msra.mxu1 %v1814_v42 }
  0xa3   :  { %719 = vmatprep.subr.bf16.mxu0 %v1813_v41  ;;  %1436 = vmatprep.subr.bf16.mxu1 %v1822_v43 }
  0xa6   :  { %720 = vmatpush1.bf16.msra.mxu0 %v1811_v44  ;;  %1437 = vmatpush1.bf16.msra.mxu1 %v1820_v46 }
  0xa7   :  { %721 = vmatprep.subr.bf16.mxu0 %v1819_v45  ;;  %1438 = vmatprep.subr.bf16.mxu1 %v1828_v47 }
  0xaa   :  { %722 = vmatpush1.bf16.msra.mxu0 %v1817_v48  ;;  %1439 = vmatpush1.bf16.msra.mxu1 %v1826_v50 }
  0xab   :  { %723 = vmatprep.subr.bf16.mxu0 %v1825_v49  ;;  %1440 = vmatprep.subr.bf16.mxu1 %v1834_v51 }
  0xae   :  { %724 = vmatpush1.bf16.msra.mxu0 %v1823_v52  ;;  %1441 = vmatpush1.bf16.msra.mxu1 %v1832_v54 }
  0xaf   :  { %725 = vmatprep.subr.bf16.mxu0 %v1831_v53  ;;  %1442 = vmatprep.subr.bf16.mxu1 %v1840_v55 }
  0xb2   :  { %726 = vmatpush1.bf16.msra.mxu0 %v1829_v56  ;;  %1443 = vmatpush1.bf16.msra.mxu1 %v1838_v58 }
  0xb3   :  { %727 = vmatprep.subr.bf16.mxu0 %v1837_v57  ;;  %1444 = vmatprep.subr.bf16.mxu1 %v1846_v59 }
  0xb6   :  { %728 = vmatpush1.bf16.msra.mxu0 %v1835_v60  ;;  %1445 = vmatpush1.bf16.msra.mxu1 %v1844_v62 }
  0xb7   :  { %729 = vmatprep.subr.bf16.mxu0 %v1843_v61  ;;  %1446 = vmatprep.subr.bf16.mxu1 %v1852_v63 }
  0xba   :  { %730 = vmatpush1.bf16.msra.mxu0 %v1841_v0  ;;  %1447 = vmatpush1.bf16.msra.mxu1 %v1850_v2 }
  0xbb   :  { %731 = vmatprep.subr.bf16.mxu0 %v1849_v1  ;;  %1448 = vmatprep.subr.bf16.mxu1 %v1858_v3 }
  0xbe   :  { %732 = vmatpush1.bf16.msra.mxu0 %v1847_v4  ;;  %1449 = vmatpush1.bf16.msra.mxu1 %v1856_v6  ;;  %v1861_v4 = vld [vmem:[#allocation5 + $0xe4] ss:$8 sps:$4 sm:$0xff]   ;;  %v1859_v6 = vld [vmem:[#allocation5 + $0xe0] ss:$8 sps:$4 sm:$0xff]  }
  0xbf   :  { %733 = vmatprep.subr.bf16.mxu0 %v1855_v5  ;;  %v1864_v5 = vld [vmem:[#allocation10 + $0xd4] ss:$8 sps:$4 sm:$0xff]  }
  0xc0   :  { %1450 = vmatprep.subr.bf16.mxu1 %v1864_v5  ;;  %v1918_v5 = vld [vmem:[#allocation10 + $0x164] ss:$8 sps:$4 sm:$0xff]  }
  0xc2   :  { %734 = vmatpush1.bf16.msra.mxu0 %v1853_v7  ;;  %v1862_v7 = vld [vmem:[#allocation10 + $0xd0] ss:$8 sps:$4 sm:$0xff]  }
  0xc3   :  { %735 = vmatprep.subr.bf16.mxu0 %v1861_v4  ;;  %1451 = vmatpush1.bf16.msra.mxu1 %v1862_v7  ;;  %v1915_v4 = vld [vmem:[#allocation5 + $0x174] ss:$8 sps:$4 sm:$0xff]   ;;  %v1916_v7 = vld [vmem:[#allocation10 + $0x160] ss:$8 sps:$4 sm:$0xff]  }
  0xc4   :  { %1452 = vmatprep.subr.bf16.mxu1 %v1870_v12  ;;  %v1924_v12 = vld [vmem:[#allocation10 + $0x174] ss:$8 sps:$4 sm:$0xff]  }
  0xc6   :  { %736 = vmatpush1.bf16.msra.mxu0 %v1859_v6  ;;  %v1913_v6 = vld [vmem:[#allocation5 + $0x170] ss:$8 sps:$4 sm:$0xff]  }
  0xc7   :  { %737 = vmatprep.subr.bf16.mxu0 %v1867_v9  ;;  %v1921_v9 = vld [vmem:[#allocation5 + $0x184] ss:$8 sps:$4 sm:$0xff]  }
  0xca   :  { %738 = vmatpush1.bf16.msra.mxu0 %v1865_v13  ;;  %v1919_v13 = vld [vmem:[#allocation5 + $0x180] ss:$8 sps:$4 sm:$0xff]  }
 0x158   :  { %v241_v16 = vpop.f32.mrb[0].mxu0  ;;  %v959_v18 = vpop.f32.mrb[0].mxu1 }
 0x159   :  { %v243_v19 = vpop.f32.mrb[1].mxu0  ;;  %v961_v21 = vpop.f32.mrb[1].mxu1  ;;  %v2338_v23 = vadd.f32 %v241_v16, %v146_v14  ;;  %v2342_v30 = vadd.f32 %v959_v18, %v868_v17  ;;  %v1868_v14 = vld [vmem:[#allocation10 + $0xe0] ss:$8 sps:$4 sm:$0xff]   ;;  %v1876_v16 = vld [vmem:[#allocation10 + $0xf4] ss:$8 sps:$4 sm:$0xff]  }
 0x15a   :  { %v2340_v24 = vadd.f32 %v243_v19, %v150_v15  ;;  %v245_v25 = vpop.f32.mrb[2].mxu0  ;;  %v963_v26 = vpop.f32.mrb[2].mxu1  ;;  %v2344_v31 = vadd.f32 %v961_v21, %v872_v20  ;;  %1453 = vmatpush1.bf16.msra.mxu1 %v1868_v14  ;;  %v1873_v15 = vld [vmem:[#allocation5 + $0x104] ss:$8 sps:$4 sm:$0xff]   ;;  %v1874_v17 = vld [vmem:[#allocation10 + $0xf0] ss:$8 sps:$4 sm:$0xff]  }
 0x15b   :  { %v246_v28 = vpop.f32.mrb[3].mxu0  ;;  %v964_v29 = vpop.f32.mrb[3].mxu1  ;;  %v296_v34 = vmul.f32 %v2338_v23, %v2338_v23  ;;  %v1013_v38 = vmul.f32 %v2342_v30, %v2342_v30  ;;  %748 = vmatprep.subr.bf16.mxu0 %v1873_v15  ;;  %1454 = vmatprep.subr.bf16.mxu1 %v1876_v16  ;;  %v1882_v18 = vld [vmem:[#allocation10 + $0x104] ss:$8 sps:$4 sm:$0xff]   ;;  %v1922_v14 = vld [vmem:[#allocation10 + $0x170] ss:$8 sps:$4 sm:$0xff]  }
 0x15c   :  { %v297_v35 = vmul.f32 %v2340_v24, %v2340_v24  ;;  %v1014_v41 = vmul.f32 %v2344_v31, %v2344_v31  ;;  %v289_v46 = vadd.f32 %v2340_v24, %v2338_v23  ;;  %v1007_v47 = vadd.f32 %v2344_v31, %v2342_v30  ;;  %v1927_v15 = vld [vmem:[#allocation5 + $0x194] ss:$8 sps:$4 sm:$0xff]   ;;  %v1930_v16 = vld [vmem:[#allocation10 + $0x184] ss:$8 sps:$4 sm:$0xff]  }
 0x15e   :  { %v300_v51 = vadd.f32 %v297_v35, %v296_v34  ;;  %v1017_v62 = vadd.f32 %v1014_v41, %v1013_v38  ;;  %1455 = vmatpush1.bf16.msra.mxu1 %v1874_v17  ;;  %v1871_v35 = vld [vmem:[#allocation5 + $0x100] ss:$8 sps:$4 sm:$0xff]   ;;  %v1925_v17 = vld [vmem:[#allocation5 + $0x190] ss:$8 sps:$4 sm:$0xff]  }
 0x15f   :  { %1465 = vmatprep.subr.bf16.mxu1 %v1882_v18  ;;  %v1928_v18 = vld [vmem:[#allocation10 + $0x180] ss:$8 sps:$4 sm:$0xff]  }
 0x160   :  { %v282_v39 = vpop.f32.mrb[4].mxu0  ;;  %v1000_v40 = vpop.f32.mrb[4].mxu1 }
 0x161   :  { %v2356_v42 = vadd.f32 %v282_v39, %v154_v32  ;;  %v2358_v43 = vadd.f32 %v1000_v40, %v876_v33  ;;  %v284_v44 = vpop.f32.mrb[5].mxu0  ;;  %v1002_v45 = vpop.f32.mrb[5].mxu1 }
 0x162   :  { %v285_v48 = vadd.f32 %v284_v44, %v158_v36  ;;  %v286_v49 = vpop.f32.mrb[6].mxu0  ;;  %v1004_v50 = vpop.f32.mrb[6].mxu1  ;;  %v2366_v53 = vadd.f32 %v1002_v45, %v880_v37  ;;  %v1879_v37 = vld [vmem:[#allocation5 + $0x114] ss:$8 sps:$4 sm:$0xff]   ;;  %v1877_v44 = vld [vmem:[#allocation5 + $0x110] ss:$8 sps:$4 sm:$0xff]  }
 0x163   :  { %v1015_v52 = vmul.f32 %v2358_v43, %v2358_v43  ;;  %v287_v54 = vpop.f32.mrb[7].mxu0  ;;  %v1005_v55 = vpop.f32.mrb[7].mxu1  ;;  %v290_v56 = vadd.f32 %v289_v46, %v2356_v42  ;;  %v298_v57 = vmul.f32 %v2356_v42, %v2356_v42  ;;  %v1008_v61 = vadd.f32 %v1007_v47, %v2358_v43  ;;  %v1880_v47 = vld [vmem:[#allocation10 + $0x100] ss:$8 sps:$4 sm:$0xff]   ;;  %v1888_v49 = vld [vmem:[#allocation10 + $0x114] ss:$8 sps:$4 sm:$0xff]  }
 0x164   :  { %v299_v58 = vmul.f32 %v285_v48, %v285_v48  ;;  %v1016_v0 = vmul.f32 %v2366_v53, %v2366_v53  ;;  %v1883_v50 = vld [vmem:[#allocation5 + $0x120] ss:$8 sps:$4 sm:$0xff]   ;;  %v1889_v54 = vld [vmem:[#allocation5 + $0x130] ss:$8 sps:$4 sm:$0xff]   ;;  %v1892_v55 = vld [vmem:[#allocation10 + $0x120] ss:$8 sps:$4 sm:$0xff]  }
 0x165   :  { %v291_v59 = vadd.f32 %v290_v56, %v285_v48  ;;  %v301_v60 = vadd.f32 %v300_v51, %v298_v57  ;;  %v1018_v1 = vadd.f32 %v1017_v62, %v1015_v52  ;;  %v1009_v2 = vadd.f32 %v1008_v61, %v2366_v53  ;;  %v1886_v51 = vld [vmem:[#allocation10 + $0x110] ss:$8 sps:$4 sm:$0xff]   ;;  %v1897_v56 = vld [vmem:[#allocation5 + $0x144] ss:$8 sps:$4 sm:$0xff]   ;;  %v1900_v57 = vld [vmem:[#allocation10 + $0x134] ss:$8 sps:$4 sm:$0xff]  }
 0x166   :  { %v1891_v52 = vld [vmem:[#allocation5 + $0x134] ss:$8 sps:$4 sm:$0xff]   ;;  %v1906_v61 = vld [vmem:[#allocation10 + $0x144] ss:$8 sps:$4 sm:$0xff]  }
 0x167   :  { %292 = vadd.xlane.f32.xlu0 %v291_v59  ;;  %v302_v63 = vadd.f32 %v301_v60, %v299_v58  ;;  %v1019_v3 = vadd.f32 %v1018_v1, %v1016_v0  ;;  %v1895_v58 = vld [vmem:[#allocation5 + $0x140] ss:$8 sps:$4 sm:$0xff]   ;;  %v1898_v59 = vld [vmem:[#allocation10 + $0x130] ss:$8 sps:$4 sm:$0xff]   ;;  %v1901_v62 = vld [vmem:[#allocation5 + $0x150] ss:$8 sps:$4 sm:$0xff]  }
 0x168   :  { %v1903_v60 = vld [vmem:[#allocation5 + $0x154] ss:$8 sps:$4 sm:$0xff]   ;;  %v1909_v0 = vld [vmem:[#allocation5 + $0x164] ss:$8 sps:$4 sm:$0xff]   ;;  %v1912_v1 = vld [vmem:[#allocation10 + $0x154] ss:$8 sps:$4 sm:$0xff]  }
 0x169   :  { %303 = vadd.xlane.f32.xlu1 %v302_v63  ;;  %v1904_v63 = vld [vmem:[#allocation10 + $0x140] ss:$8 sps:$4 sm:$0xff]  }
 0x16b   :  { %1010 = vadd.xlane.f32.xlu0 %v1009_v2  ;;  %v1907_v2 = vld [vmem:[#allocation5 + $0x160] ss:$8 sps:$4 sm:$0xff]  }
 0x16d   :  { %1020 = vadd.xlane.f32.xlu1 %v1019_v3  ;;  %v1910_v3 = vld [vmem:[#allocation10 + $0x150] ss:$8 sps:$4 sm:$0xff]  }
 0x1f4   :  { %v293_v19 = vpop.xlane.xlu0 %292 }
 0x1f5   :  { %v2375_v20 = vmul.f32 0.001953125, %v293_v19  ;;  %v1933_v19 = vld [vmem:[#allocation5 + $0x1a4] ss:$8 sps:$4 sm:$0xff]  }
 0x1f7   :  { %v312_v21 = vsub.f32 %v2340_v24, %v2375_v20  ;;  %v311_v25 = vsub.f32 %v2338_v23, %v2375_v20  ;;  %v314_v27 = vsub.f32 %v285_v48, %v2375_v20 }
 0x1f8   :  { %v1011_v26 = vpop.xlane.xlu0 %1010 }
 0x1f9   :  { %v2382_v28 = vmul.f32 0.001953125, %v1011_v26  ;;  %v316_v29 = vmax.f32 %v312_v21, 0.0  ;;  %v315_v32 = vmax.f32 %v311_v25, 0.0  ;;  %v318_v33 = vmax.f32 %v314_v27, 0.0  ;;  %v1936_v21 = vld [vmem:[#allocation10 + $0x194] ss:$8 sps:$4 sm:$0xff]  }
 0x1fa   :  { %v1931_v25 = vld [vmem:[#allocation5 + $0x1a0] ss:$8 sps:$4 sm:$0xff]   ;;  %v1934_v26 = vld [vmem:[#allocation10 + $0x190] ss:$8 sps:$4 sm:$0xff]  }
 0x1fb   :  { %v320_v34 = vpack.c.bf16 %v316_v29, %v316_v29  ;;  %v319_v36 = vpack.c.bf16 %v315_v32, %v315_v32  ;;  %v1029_v38 = vsub.f32 %v2344_v31, %v2382_v28  ;;  %v1028_v24 = vsub.f32 %v2342_v30, %v2382_v28  ;;  %v1885_v31 = vld [vmem:[#allocation5 + $0x124] ss:$8 sps:$4 sm:$0xff]   ;;  %v1939_v27 = vld [vmem:[#allocation5 + $0x1b4] ss:$8 sps:$4 sm:$0xff]   ;;  %v1942_v29 = vld [vmem:[#allocation10 + $0x1a4] ss:$8 sps:$4 sm:$0xff]  }
 0x1fc   :  { %v322_v23 = vpack.c.bf16 %v318_v33, %v318_v33  ;;  %v1031_v39 = vsub.f32 %v2366_v53, %v2382_v28  ;;  %v1894_v53 = vld [vmem:[#allocation10 + $0x124] ss:$8 sps:$4 sm:$0xff]   ;;  %v1940_v33 = vld [vmem:[#allocation10 + $0x1a0] ss:$8 sps:$4 sm:$0xff]  }
 0x1fd   :  { %739 = vmatprep.mubr.bf16.mxu0 %v320_v34  ;;  %v1033_v40 = vmax.f32 %v1029_v38, 0.0  ;;  %v1032_v41 = vmax.f32 %v1028_v24, 0.0  ;;  %v1937_v32 = vld [vmem:[#allocation5 + $0x1b0] ss:$8 sps:$4 sm:$0xff]   ;;  %v1945_v34 = vld [vmem:[#allocation5 + $0x1c4] ss:$8 sps:$4 sm:$0xff]  }
 0x1fe   :  { %740 = vmatmul.mubr.bf16.vlgmr.msra.gmra.mrb[8].mxu0 %v319_v36  ;;  %v1035_v45 = vmax.f32 %v1031_v39, 0.0  ;;  %v1943_v36 = vld [vmem:[#allocation5 + $0x1c0] ss:$8 sps:$4 sm:$0xff]   ;;  %v1951_v38 = vld [vmem:[#allocation5 + $0x1d4] ss:$8 sps:$4 sm:$0xff]  }
 0x1ff   :  { %749 = vmatpush1.bf16.msra.mxu0 %v1871_v35  ;;  %780 = vmatprep.mubr.bf16.mxu0 %v322_v23  ;;  %v1037_v46 = vpack.c.bf16 %v1033_v40, %v1033_v40  ;;  %v1036_v48 = vpack.c.bf16 %v1032_v41, %v1032_v41  ;;  %v1948_v35 = vld [vmem:[#allocation10 + $0x1b4] ss:$8 sps:$4 sm:$0xff]   ;;  %v1954_v24 = vld [vmem:[#allocation10 + $0x1c4] ss:$8 sps:$4 sm:$0xff]   ;;  %v1952_v39 = vld [vmem:[#allocation10 + $0x1c0] ss:$8 sps:$4 sm:$0xff]  }
 0x200   :  { %750 = vmatprep.subr.bf16.mxu0 %v1879_v37  ;;  %v1039_v30 = vpack.c.bf16 %v1035_v45, %v1035_v45  ;;  %v1946_v37 = vld [vmem:[#allocation10 + $0x1b0] ss:$8 sps:$4 sm:$0xff]   ;;  %v1949_v23 = vld [vmem:[#allocation5 + $0x1d0] ss:$8 sps:$4 sm:$0xff]   ;;  %v1957_v40 = vld [vmem:[#allocation5 + $0x1e4] ss:$8 sps:$4 sm:$0xff]  }
 0x201   :  { %1456 = vmatprep.mubr.bf16.mxu1 %v1037_v46  ;;  %v1960_v41 = vld [vmem:[#allocation10 + $0x1d4] ss:$8 sps:$4 sm:$0xff]   ;;  %v1958_v45 = vld [vmem:[#allocation10 + $0x1d0] ss:$8 sps:$4 sm:$0xff]  }
 0x202   :  { %1457 = vmatmul.mubr.bf16.vlgmr.msra.gmra.mrb[8].mxu1 %v1036_v48  ;;  %v1963_v46 = vld [vmem:[#allocation5 + $0x1f4] ss:$8 sps:$4 sm:$0xff]   ;;  %v1966_v48 = vld [vmem:[#allocation10 + $0x1e4] ss:$8 sps:$4 sm:$0xff]  }
 0x203   :  { %751 = vmatpush1.bf16.msra.mxu0 %v1877_v44  ;;  %1466 = vmatpush1.bf16.msra.mxu1 %v1880_v47  ;;  %v1955_v44 = vld [vmem:[#allocation5 + $0x1e0] ss:$8 sps:$4 sm:$0xff]   ;;  %v313_v47 = vsub.f32 %v2356_v42, %v2375_v20 }
 0x204   :  { %1497 = vmatprep.mubr.bf16.mxu1 %v1039_v30  ;;  %752 = vmatprep.subr.bf16.mxu0 %v1885_v31  ;;  %v1961_v31 = vld [vmem:[#allocation5 + $0x1f0] ss:$8 sps:$4 sm:$0xff]  }
 0x205   :  { %1467 = vmatprep.subr.bf16.mxu1 %v1888_v49  ;;  %v1964_v49 = vld [vmem:[#allocation10 + $0x1e0] ss:$8 sps:$4 sm:$0xff]   ;;  %v317_v30 = vmax.f32 %v313_v47, 0.0 }
 0x207   :  { %753 = vmatpush1.bf16.msra.mxu0 %v1883_v50  ;;  %1468 = vmatpush1.bf16.msra.mxu1 %v1886_v51  ;;  %v1969_v50 = vld [vmem:[#allocation10 + $0x1f4] ss:$8 sps:$4 sm:$0xff]   ;;  %v1030_v51 = vsub.f32 %v2358_v43, %v2382_v28  ;;  %v1023_v43 = vmul.f32 %v2382_v28, %v2382_v28 }
 0x208   :  { %754 = vmatprep.subr.bf16.mxu0 %v1891_v52  ;;  %1469 = vmatprep.subr.bf16.mxu1 %v1894_v53  ;;  %v321_v52 = vpack.c.bf16 %v317_v30, %v317_v30  ;;  %v1967_v53 = vld [vmem:[#allocation10 + $0x1f0] ss:$8 sps:$4 sm:$0xff]  }
 0x20b   :  { %755 = vmatpush1.bf16.msra.mxu0 %v1889_v54  ;;  %1470 = vmatpush1.bf16.msra.mxu1 %v1892_v55  ;;  %v1034_v54 = vmax.f32 %v1030_v51, 0.0  ;;  %v304_v55 = vpop.xlane.xlu1 %303 }
 0x20c   :  { %756 = vmatprep.subr.bf16.mxu0 %v1897_v56  ;;  %1471 = vmatprep.subr.bf16.mxu1 %v1900_v57  ;;  %v305_v56 = vmul.f32 0.001953125, %v304_v55  ;;  %v306_v57 = vmul.f32 %v2375_v20, %v2375_v20 }
 0x20d   :  { %v1038_v42 = vpack.c.bf16 %v1034_v54, %v1034_v54 }
 0x20f   :  { %757 = vmatpush1.bf16.msra.mxu0 %v1895_v58  ;;  %1472 = vmatpush1.bf16.msra.mxu1 %v1898_v59  ;;  %v1021_v58 = vpop.xlane.xlu1 %1020  ;;  %v307_v59 = vsub.f32 %v305_v56, %v306_v57 }
 0x210   :  { %758 = vmatprep.subr.bf16.mxu0 %v1903_v60  ;;  %1473 = vmatprep.subr.bf16.mxu1 %v1906_v61  ;;  %v1022_v60 = vmul.f32 0.001953125, %v1021_v58 }
 0x211   :  { %v308_v61 = vmax.f32 %v307_v59, 0.0 }
 0x213   :  { %759 = vmatpush1.bf16.msra.mxu0 %v1901_v62  ;;  %1474 = vmatpush1.bf16.msra.mxu1 %v1904_v63  ;;  %v1024_v62 = vsub.f32 %v1022_v60, %v1023_v43  ;;  %v309_v63 = vadd.f32 1e-05, %v308_v61 }
 0x214   :  { %760 = vmatprep.subr.bf16.mxu0 %v1909_v0  ;;  %1475 = vmatprep.subr.bf16.mxu1 %v1912_v1 }
 0x215   :  { %v1025_v0 = vmax.f32 %v1024_v62, 0.0  ;;  %1970 = vrsqrt.f32 %v309_v63 }
 0x217   :  { %761 = vmatpush1.bf16.msra.mxu0 %v1907_v2  ;;  %1476 = vmatpush1.bf16.msra.mxu1 %v1910_v3  ;;  %v1026_v1 = vadd.f32 1e-05, %v1025_v0  ;;  %v791_v2 = vld [vmem:[#allocation7] sm:$0x3] }
 0x218   :  { %762 = vmatprep.subr.bf16.mxu0 %v1915_v4  ;;  %1477 = vmatprep.subr.bf16.mxu1 %v1918_v5  ;;  %v796_v3 = vrot.slane %v791_v2, %v2322_v10  ;;  %v800_v20 = vrot.slane %v791_v2, %v2324_v11 }
 0x219   :  { %1972 = vrsqrt.f32 %v1026_v1 }
 0x21b   :  { %763 = vmatpush1.bf16.msra.mxu0 %v1913_v6  ;;  %1478 = vmatpush1.bf16.msra.mxu1 %v1916_v7 }
 0x21c   :  { %764 = vmatprep.subr.bf16.mxu0 %v1921_v9  ;;  %1479 = vmatprep.subr.bf16.mxu1 %v1924_v12  ;;  %v1508_v9 = vld [vmem:[#allocation11] sm:$0x3] }
 0x21f   :  { %765 = vmatpush1.bf16.msra.mxu0 %v1919_v13  ;;  %1480 = vmatpush1.bf16.msra.mxu1 %v1922_v14  ;;  %v1971_v4 = vpop.eup %1970 }
 0x220   :  { %766 = vmatprep.subr.bf16.mxu0 %v1927_v15  ;;  %1481 = vmatprep.subr.bf16.mxu1 %v1930_v16  ;;  %v1513_v16 = vrot.slane %v1508_v9, %v2322_v10 }
 0x223   :  { %767 = vmatpush1.bf16.msra.mxu0 %v1925_v17  ;;  %1482 = vmatpush1.bf16.msra.mxu1 %v1928_v18  ;;  %v1973_v17 = vpop.eup %1972 }
 0x224   :  { %768 = vmatprep.subr.bf16.mxu0 %v1933_v19  ;;  %1483 = vmatprep.subr.bf16.mxu1 %v1936_v21  ;;  %v1517_v19 = vrot.slane %v1508_v9, %v2324_v11  ;;  %v825_v11 = vld [vmem:[#allocation8] sm:$0x3] }
 0x227   :  { %769 = vmatpush1.bf16.msra.mxu0 %v1931_v25  ;;  %1484 = vmatpush1.bf16.msra.mxu1 %v1934_v26 }
 0x228   :  { %770 = vmatprep.subr.bf16.mxu0 %v1939_v27  ;;  %1485 = vmatprep.subr.bf16.mxu1 %v1942_v29 }
 0x22b   :  { %771 = vmatpush1.bf16.msra.mxu0 %v1937_v32  ;;  %1486 = vmatpush1.bf16.msra.mxu1 %v1940_v33 }
 0x22c   :  { %772 = vmatprep.subr.bf16.mxu0 %v1945_v34  ;;  %1487 = vmatprep.subr.bf16.mxu1 %v1948_v35 }
 0x22f   :  { %773 = vmatpush1.bf16.msra.mxu0 %v1943_v36  ;;  %1488 = vmatpush1.bf16.msra.mxu1 %v1946_v37 }
 0x230   :  { %774 = vmatprep.subr.bf16.mxu0 %v1951_v38  ;;  %1489 = vmatprep.subr.bf16.mxu1 %v1954_v24 }
 0x233   :  { %775 = vmatpush1.bf16.msra.mxu0 %v1949_v23  ;;  %1490 = vmatpush1.bf16.msra.mxu1 %v1952_v39 }
 0x234   :  { %776 = vmatprep.subr.bf16.mxu0 %v1957_v40  ;;  %1491 = vmatprep.subr.bf16.mxu1 %v1960_v41  ;;  %v826_v40 = vunpack.c.l.bf16 %v825_v11  ;;  %v1541_v41 = vld [vmem:[%s2427_s10] sm:$0x3]  ;;  %s132_s10 = sld [smem:[#allocation13]] }
 0x235   :  { %v1542_v47 = vunpack.c.l.bf16 %v1541_v41 }
 0x237   :  { %777 = vmatpush1.bf16.msra.mxu0 %v1955_v44  ;;  %1492 = vmatpush1.bf16.msra.mxu1 %v1958_v45  ;;  %v831_v44 = vrot.slane %v826_v40, %v2322_v10  ;;  %v835_v45 = vrot.slane %v826_v40, %v2336_v22  ;;  %v1547_v51 = vrot.slane %v1542_v47, %v2322_v10 }
 0x238   :  { %778 = vmatprep.subr.bf16.mxu0 %v1963_v46  ;;  %1493 = vmatprep.subr.bf16.mxu1 %v1966_v48 }
 0x239   :  { %v841_v30 = vrot.slane %v831_v44, %v2322_v10  ;;  %v1557_v60 = vrot.slane %v1547_v51, %v2322_v10 }
 0x23b   :  { %779 = vmatpush1.bf16.msra.mxu0 %v1961_v31  ;;  %1494 = vmatpush1.bf16.msra.mxu1 %v1964_v49 }
 0x23c   :  { %1495 = vmatprep.subr.bf16.mxu1 %v1969_v50  ;;  %v845_v50 = vrot.slane %v835_v45, %v2322_v10 }
 0x23e   :  { %781 = vmatmul.mubr.bf16.vlgmr.msra.gmra.mrb[8].mxu0 %v321_v52  ;;  %v1551_v52 = vrot.slane %v1542_v47, %v2336_v22 }
 0x23f   :  { %1496 = vmatpush1.bf16.msra.mxu1 %v1967_v53 }
 0x240   :  { %v1561_v43 = vrot.slane %v1551_v52, %v2322_v10 }
 0x242   :  { %1498 = vmatmul.mubr.bf16.vlgmr.msra.gmra.mrb[8].mxu1 %v1038_v42 }
 0x311   :  { %v782_v5 = vpop.f32.mrb[8].mxu0 }
 0x312   :  { %v789_v6 = vmul.f32 %v1971_v4, %v782_v5  ;;  %v784_v7 = vpop.f32.mrb[9].mxu0 }
 0x313   :  { %v790_v12 = vmul.f32 %v1971_v4, %v784_v7  ;;  %v786_v13 = vpop.f32.mrb[10].mxu0 }
 0x314   :  { %v803_v28 = vadd.f32 %v796_v3, %v789_v6  ;;  %v787_v14 = vpop.f32.mrb[11].mxu0 }
 0x315   :  { %v804_v15 = vadd.f32 %v800_v20, %v790_v12  ;;  %v1499_v18 = vpop.f32.mrb[8].mxu1 }
 0x316   :  { %v1506_v21 = vmul.f32 %v1973_v17, %v1499_v18  ;;  %v1501_v25 = vpop.f32.mrb[9].mxu1  ;;  %v810_v27 = vmul.f32 %v803_v28, %v803_v28 }
 0x317   :  { %v805_v26 = vadd.f32 %v804_v15, %v803_v28  ;;  %v811_v29 = vmul.f32 %v804_v15, %v804_v15  ;;  %v1507_v32 = vmul.f32 %v1973_v17, %v1501_v25  ;;  %v1503_v33 = vpop.f32.mrb[10].mxu1 }
 0x318   :  { %v1520_v34 = vadd.f32 %v1513_v16, %v1506_v21  ;;  %v1504_v35 = vpop.f32.mrb[11].mxu1  ;;  %v1571_v16 = vand.u32 127, %v143_v8  ;;  %v1568_v21 = vstv %s1659_s8 }
 0x319   :  { %806 = vadd.xlane.f32.xlu0 %v805_v26  ;;  %v1521_v36 = vadd.f32 %v1517_v19, %v1507_v32  ;;  %v812_v37 = vadd.f32 %v811_v29, %v810_v27  ;;  %v852_v19 = vstv %s132_s10 }
 0x31a   :  { %v1526_v24 = vmul.f32 %v1520_v34, %v1520_v34  ;;  %vm1572_vm1 = vcmp.eq.s32.totalorder %v1571_v16, 0 }
 0x31b   :  { %v1522_v38 = vadd.f32 %v1521_v36, %v1520_v34  ;;  %v1527_v23 = vmul.f32 %v1521_v36, %v1521_v36 }
 0x31d   :  { %813 = vadd.xlane.f32.xlu0 %v812_v37  ;;  %1523 = vadd.xlane.f32.xlu1 %v1522_v38  ;;  %v1528_v39 = vadd.f32 %v1527_v23, %v1526_v24 }
 0x321   :  { %1529 = vadd.xlane.f32.xlu1 %v1528_v39 }
 0x3a6   :  { %v807_v46 = vpop.xlane.xlu0 %806 }
 0x3a7   :  { %v809_v48 = vmul.f32 0.00390625, %v807_v46 }
 0x3a9   :  { %v821_v31 = vsub.f32 %v803_v28, %v809_v48  ;;  %v822_v49 = vsub.f32 %v804_v15, %v809_v48  ;;  %v816_v5 = vmul.f32 %v809_v48, %v809_v48 }
 0x3aa   :  { %v1524_v53 = vpop.xlane.xlu1 %1523  ;;  %v814_v22 = vpop.xlane.xlu0 %813 }
 0x3ab   :  { %v823_v54 = vmax.f32 %v821_v31, 0.0  ;;  %v824_v42 = vmax.f32 %v822_v49, 0.0  ;;  %v1525_v55 = vmul.f32 0.00390625, %v1524_v53  ;;  %v815_v4 = vmul.f32 0.00390625, %v814_v22 }
 0x3ad   :  { %v846_v56 = vmul.f32 %v841_v30, %v823_v54  ;;  %v847_v57 = vmul.f32 %v845_v50, %v824_v42  ;;  %v1537_v58 = vsub.f32 %v1520_v34, %v1525_v55  ;;  %v1538_v59 = vsub.f32 %v1521_v36, %v1525_v55 }
 0x3ae   :  { %v1530_v3 = vpop.xlane.xlu1 %1529  ;;  %v817_v6 = vsub.f32 %v815_v4, %v816_v5  ;;  %v1532_v7 = vmul.f32 %v1525_v55, %v1525_v55 }
 0x3af   :  { %v848_v61 = vadd.f32 %v847_v57, %v846_v56  ;;  %v1539_v62 = vmax.f32 %v1537_v58, 0.0  ;;  %v1540_v63 = vmax.f32 %v1538_v59, 0.0  ;;  %v1531_v20 = vmul.f32 0.00390625, %v1530_v3 }
 0x3b0   :  { %v818_v12 = vmax.f32 %v817_v6, 0.0 }
 0x3b1   :  { %849 = vadd.xlane.f32.xlu0 %v848_v61  ;;  %v1562_v0 = vmul.f32 %v1557_v60, %v1539_v62  ;;  %v1563_v1 = vmul.f32 %v1561_v43, %v1540_v63  ;;  %v1533_v9 = vsub.f32 %v1531_v20, %v1532_v7 }
 0x3b2   :  { %v819_v28 = vadd.f32 1e-05, %v818_v12 }
 0x3b3   :  { %v1564_v2 = vadd.f32 %v1563_v1, %v1562_v0  ;;  %v1534_v13 = vmax.f32 %v1533_v9, 0.0 }
 0x3b4   :  { %1974 = vrsqrt.f32 %v819_v28 }
 0x3b5   :  { %1565 = vadd.xlane.f32.xlu1 %v1564_v2  ;;  %v1535_v10 = vadd.f32 1e-05, %v1534_v13 }
 0x3b7   :  { %1976 = vrsqrt.f32 %v1535_v10 }
 0x3be   :  { %v1975_v15 = vpop.eup %1974 }
 0x3c1   :  { %v1977_v18 = vpop.eup %1976 }
 0x43e   :  { %v850_v14 = vpop.xlane.xlu0 %849 }
 0x43f   :  { %v851_v17 = vmul.f32 %v1975_v15, %v850_v14 }
 0x441   :  { %v853_v27 = vadd.f32 %v852_v19, %v851_v17 }
 0x442   :  { %v1566_v25 = vpop.xlane.xlu1 %1565 }
 0x443   :  { %v1567_v26 = vmul.f32 %v1977_v18, %v1566_v25 }
 0x445   :  { %v1569_v29 = vadd.f32 %v1568_v21, %v1567_v26 }
 0x447   :  { %v1573_v32 = vsel %vm1572_vm1, %v853_v27, %v1569_v29 }
 0x448   :  { %1575 = vst.msk [vmem:[%s2429_s12] sm:$0xff] %vm1574_vm2, %v1573_v32 }
 0x449   :  { %1580 = vsyncpa [#allocation3], 1 }
 0x44a   :  { %1581 = vsyncpa [#allocation6], 1 }
 0x44b   :  { %1582 = vsyncpa [#allocation9], 1 }
 0x44c   :  { %1583 = vsyncpa [#allocation12], 1 }
 0x44d   :  { %1584 = vsyncpa [#allocation4], 1 }

</bundles_post_ra>
